<compile_context>
chip_gen: v5e
topology: v5e:2x2
jax: 0.10.0
libtpu: 0.0.40
codegen_flags: <defaults>
</compile_context>

<pallas_src>
import jax
import jax.numpy as jnp
from jax.experimental import pallas as pl
from jax.experimental.pallas import tpu as pltpu


# ---------------------------------------------------------------------------
# Pass 1: fused 1x1 projections (theta | phi | g) + 2x2 max-pool of phi and g.
# ---------------------------------------------------------------------------
def _proj_pool_kernel(x_ref, wf_ref, theta_ref, phi_ref, g_ref):
    q = pl.program_id(1)                  # pooling-window slot, reduction axis
    c8 = theta_ref.shape[-1]

    x = x_ref[...].astype(jnp.bfloat16)                              # (P, C)
    # One lane-dense matmul for all three projections:
    #   (P, C) @ (C, C/8 + C/8 + C/2), f32 accumulation on the MXU.
    proj = jnp.dot(x, wf_ref[...], preferred_element_type=jnp.float32)

    theta_ref[...] = proj[:, :c8].astype(theta_ref.dtype)            # slot-q theta rows
    phi_q = proj[:, c8:2 * c8].astype(phi_ref.dtype)                 # (P, C/8)
    g_q = proj[:, 2 * c8:].astype(g_ref.dtype)                       # (P, C/2)

    @pl.when(q == 0)
    def _():
        phi_ref[...] = phi_q
        g_ref[...] = g_q

    @pl.when(q > 0)
    def _():
        phi_ref[...] = jnp.maximum(phi_ref[...], phi_q)              # running 2x2 max-pool
        g_ref[...] = jnp.maximum(g_ref[...], g_q)


# ---------------------------------------------------------------------------
# Pass 2: attention + output 1x1 conv + residual, tiled over query rows.
# ---------------------------------------------------------------------------
def _attn_kernel(x_ref, theta_ref, phit_ref, g_ref, wo_ref, gamma_ref, out_ref):
    x = x_ref[...]                                                   # (TQ, C)
    theta = theta_ref[...]                                           # (TQ, C/8) bf16

    # scores[s, p] = <theta[s], phi_pooled[p]>; phi is pre-transposed to (C/8, P)
    # so this is a plain NN matmul (no implicit XLU transpose per tile).
    scores = jnp.dot(theta, phit_ref[...],
                     preferred_element_type=jnp.float32)             # (TQ, P) f32

    # Exact softmax over the pooled axis, normalization deferred past the
    # value matmul (row scaling commutes with the matmul).
    m = jnp.max(scores, axis=-1, keepdims=True)
    e = jnp.exp(scores - m)                                          # (TQ, P) f32
    denom = jnp.sum(e, axis=-1, keepdims=True)                       # (TQ, 1) f32

    o_mid = jnp.dot(e.astype(jnp.bfloat16), g_ref[...],
                    preferred_element_type=jnp.float32)              # (TQ, C/2) f32
    o_mid = o_mid * pl.reciprocal(denom, approx=True)                # normalize (EUP slot)

    o = jnp.dot(o_mid.astype(jnp.bfloat16), wo_ref[...],
                preferred_element_type=jnp.float32)                  # (TQ, C) f32

    gamma = gamma_ref[0]                                             # scalar from SMEM
    out_ref[...] = (gamma * o + x.astype(jnp.float32)).astype(out_ref.dtype)


def _pick_query_tile(hw):
    # Largest "nice" tile (<= 512) dividing HW; TQ bounds per-step VMEM so real
    # BigGAN sizes stay within v7x's 64 MiB (bigger tiles are fine on v5e/v6e).
    for cand in (512, 256, 128, 64, 32, 16, 8):
        if cand <= hw and hw % cand == 0:
            return cand
    return hw


def attention_block(x_nchw, w_theta, w_phi, w_g, w_o, gamma):
    """Pallas implementation of AttentionBlock.forward.

    x_nchw : (B, C, H, W) float32
    w_theta: (C//8, C)   effective 1x1-conv weights (spectral_norm already applied)
    w_phi  : (C//8, C)
    w_g    : (C//2, C)
    w_o    : (C, C//2)
    gamma  : scalar
    """
    B, C, H, W = x_nchw.shape
    assert C % 8 == 0 and H % 2 == 0 and W % 2 == 0
    HW = H * W
    P = HW // 4
    C8, C2 = C // 8, C // 2
    CF = 2 * C8 + C2
    assert P % 8 == 0, "pooled spatial size must be a multiple of 8 sublanes"

    # Single composed permutation: NCHW -> (B, HW, C) with row = q*P + p.
    x_perm = jnp.transpose(
        x_nchw.reshape(B, C, H // 2, 2, W // 2, 2),
        (0, 3, 5, 2, 4, 1)).reshape(B, HW, C)

    # Fused projection weights, (in_channels, out_channels) orientation, bf16 MXU.
    w_fused = jnp.concatenate(
        [jnp.transpose(w_theta), jnp.transpose(w_phi), jnp.transpose(w_g)],
        axis=1).astype(jnp.bfloat16)                                 # (C, 3C/4)
    wo = jnp.transpose(w_o).astype(jnp.bfloat16)                     # (C/2, C)
    gamma_arr = jnp.asarray(gamma, jnp.float32).reshape(1)

    vmem_limit = 48 * 1024 * 1024   # above default scoped limits, below v7x physical

    # ---- pass 1: fused projections + 2x2 max-pool of phi / g --------------
    theta, phi_pool, g_pool = pl.pallas_call(
        _proj_pool_kernel,
        out_shape=(
            jax.ShapeDtypeStruct((B, HW, C8), jnp.bfloat16),         # theta (all rows)
            jax.ShapeDtypeStruct((B, P, C8), jnp.bfloat16),          # pooled phi
            jax.ShapeDtypeStruct((B, P, C2), jnp.bfloat16),          # pooled g
        ),
        grid=(B, 4),
        in_specs=[
            pl.BlockSpec((None, P, C), lambda b, q: (b, q, 0)),
            pl.BlockSpec((C, CF), lambda b, q: (0, 0)),
        ],
        out_specs=(
            pl.BlockSpec((None, P, C8), lambda b, q: (b, q, 0)),
            pl.BlockSpec((None, P, C8), lambda b, q: (b, 0, 0)),     # revisited (max)
            pl.BlockSpec((None, P, C2), lambda b, q: (b, 0, 0)),     # revisited (max)
        ),
        compiler_params=pltpu.CompilerParams(
            dimension_semantics=("parallel", "arbitrary"),
            vmem_limit_bytes=vmem_limit),
    )(x_perm, w_fused)

    # Tiny tensor; transpose once here so pass 2's score matmul is plain NN.
    phi_t = jnp.swapaxes(phi_pool, 1, 2)                             # (B, C/8, P)

    # ---- pass 2: attention, output projection, residual -------------------
    TQ = _pick_query_tile(HW)
    out_perm = pl.pallas_call(
        _attn_kernel,
        out_shape=jax.ShapeDtypeStruct((B, HW, C), x_nchw.dtype),
        grid=(B, HW // TQ),
        in_specs=[
            pl.BlockSpec((None, TQ, C), lambda b, t: (b, t, 0)),     # x tile
            pl.BlockSpec((None, TQ, C8), lambda b, t: (b, t, 0)),    # theta tile
            pl.BlockSpec((None, C8, P), lambda b, t: (b, 0, 0)),     # phi^T (resident)
            pl.BlockSpec((None, P, C2), lambda b, t: (b, 0, 0)),     # g pooled (resident)
            pl.BlockSpec((C2, C), lambda b, t: (0, 0)),              # W_o (resident)
            pl.BlockSpec(memory_space=pltpu.MemorySpace.SMEM),       # gamma scalar
        ],
        out_specs=pl.BlockSpec((None, TQ, C), lambda b, t: (b, t, 0)),
        compiler_params=pltpu.CompilerParams(
            dimension_semantics=("parallel", "parallel"),
            vmem_limit_bytes=vmem_limit),
    )(x_perm, theta, phi_t, g_pool, wo, gamma_arr)

    # Inverse permutation: (B, HW, C) -> NCHW (single composed transpose).
    out = jnp.transpose(
        out_perm.reshape(B, 2, 2, H // 2, W // 2, C),
        (0, 5, 3, 1, 4, 2)).reshape(B, C, H, W)
    return out


def attention_block_ref(x, w_theta, w_phi, w_g, w_o, gamma):
    """Pure-JAX f32 reference mirroring the PyTorch forward (for verification)."""
    B, C, H, W = x.shape
    HW = H * W
    conv = lambda w, t: jnp.einsum('oc,bchw->bohw', w, t)

    def pool(t):
        b, c, h, w = t.shape
        return t.reshape(b, c, h // 2, 2, w // 2, 2).max(axis=(3, 5))

    theta = conv(w_theta, x).reshape(B, C // 8, HW)
    phi = pool(conv(w_phi, x)).reshape(B, C // 8, HW // 4)
    g = pool(conv(w_g, x)).reshape(B, C // 2, HW // 4)
    beta = jax.nn.softmax(jnp.einsum('bcs,bcp->bsp', theta, phi), axis=-1)
    o_mid = jnp.einsum('bcp,bsp->bcs', g, beta).reshape(B, C // 2, H, W)
    o = conv(w_o, o_mid)
    return gamma * o + x


if __name__ == "__main__":
    key = jax.random.PRNGKey(0)
    B, C, H, W = 2, 32, 16, 16
    k = jax.random.split(key, 5)

    x = jax.random.normal(k[0], (B, C, H, W), jnp.float32)
    w_theta = 0.1 * jax.random.normal(k[1], (C // 8, C), jnp.float32)
    w_phi = 0.1 * jax.random.normal(k[2], (C // 8, C), jnp.float32)
    w_g = 0.1 * jax.random.normal(k[3], (C // 2, C), jnp.float32)
    w_o = 0.1 * jax.random.normal(k[4], (C, C // 2), jnp.float32)
    # PyTorch initializes gamma to 0.0 (output == x); use a nonzero value so the
    # attention path is actually exercised and checked.
    gamma = jnp.float32(0.5)

    out = jax.block_until_ready(attention_block(x, w_theta, w_phi, w_g, w_o, gamma))
    ref = attention_block_ref(x, w_theta, w_phi, w_g, w_o, gamma)

    assert out.shape == x.shape and out.dtype == x.dtype
    max_err = float(jnp.max(jnp.abs(out - ref)))
    # bf16 MXU operands (f32 accumulation) => looser tolerance vs the f32 reference.
    assert jnp.allclose(out, ref, atol=2e-2, rtol=2e-2), f"max_err={max_err}"
    print("KERNEL_OK")
</pallas_src>

<mosaic_0001>
module attributes {stable_mosaic.version = 11 : i64} {
  func.func @_proj_pool_kernel(%arg0: i32, %arg1: i32, %arg2: memref<1x64x32xf32, #tpu.memory_space<vmem>>, %arg3: memref<32x24xbf16, #tpu.memory_space<vmem>>, %arg4: memref<1x64x4xbf16, #tpu.memory_space<vmem>>, %arg5: memref<1x64x4xbf16, #tpu.memory_space<vmem>>, %arg6: memref<1x64x16xbf16, #tpu.memory_space<vmem>>) attributes {dimension_semantics = [#tpu.dimension_semantics<parallel>, #tpu.dimension_semantics<arbitrary>], iteration_bounds = array<i64: 2, 4>, scalar_prefetch = 0 : i64, scratch_operands = 0 : i64, tpu.core_type = #tpu.core_type<tc>, window_params = [{transform_indices = @transform_0, window_bounds = array<i64: 1, 64, 32>}, {pipeline_mode = #tpu.pipeline_mode<synchronous>, transform_indices = @transform_1, window_bounds = array<i64: 32, 24>}, {transform_indices = @transform_2, window_bounds = array<i64: 1, 64, 4>}, {transform_indices = @transform_3, window_bounds = array<i64: 1, 64, 4>}, {transform_indices = @transform_4, window_bounds = array<i64: 1, 64, 16>}]} {
    %c0 = arith.constant 0 : index
    %c0_0 = arith.constant 0 : index
    %c0_1 = arith.constant 0 : index
    %0 = vector.load %arg2[%c0, %c0_0, %c0_1] : memref<1x64x32xf32, #tpu.memory_space<vmem>>, vector<1x64x32xf32>
    %1 = vector.shape_cast %0 : vector<1x64x32xf32> to vector<64x32xf32>
    %2 = arith.truncf %1 : vector<64x32xf32> to vector<64x32xbf16>
    %c0_2 = arith.constant 0 : index
    %c0_3 = arith.constant 0 : index
    %3 = vector.load %arg3[%c0_2, %c0_3] : memref<32x24xbf16, #tpu.memory_space<vmem>>, vector<32x24xbf16>
    %cst = arith.constant dense<0.000000e+00> : vector<64x24xf32>
    %4 = tpu.matmul %2, %3, %cst {dimension_numbers = #tpu.dot_dimension_numbers<[1], [0], [0], [1], [0, 0, 1, 1], [], []>} : vector<64x32xbf16>, vector<32x24xbf16>, vector<64x24xf32> -> vector<64x24xf32>
    %5 = vector.extract_strided_slice %4 {offsets = [0, 0], sizes = [64, 4], strides = [1, 1]} : vector<64x24xf32> to vector<64x4xf32>
    %6 = arith.truncf %5 : vector<64x4xf32> to vector<64x4xbf16>
    %c0_4 = arith.constant 0 : index
    %c0_5 = arith.constant 0 : index
    %c0_6 = arith.constant 0 : index
    %7 = vector.load %arg4[%c0_4, %c0_5, %c0_6] : memref<1x64x4xbf16, #tpu.memory_space<vmem>>, vector<1x64x4xbf16>
    %8 = vector.shape_cast %7 : vector<1x64x4xbf16> to vector<64x4xbf16>
    %9 = vector.shape_cast %6 : vector<64x4xbf16> to vector<1x64x4xbf16>
    tpu.vector_store %arg4[%c0_4, %c0_5, %c0_6], %9 {strides = array<i32>} : memref<1x64x4xbf16, #tpu.memory_space<vmem>>, vector<1x64x4xbf16>,
    %10 = vector.extract_strided_slice %4 {offsets = [0, 4], sizes = [64, 4], strides = [1, 1]} : vector<64x24xf32> to vector<64x4xf32>
    %11 = arith.truncf %10 : vector<64x4xf32> to vector<64x4xbf16>
    %12 = vector.extract_strided_slice %4 {offsets = [0, 8], sizes = [64, 16], strides = [1, 1]} : vector<64x24xf32> to vector<64x16xf32>
    %13 = arith.truncf %12 : vector<64x16xf32> to vector<64x16xbf16>
    %c0_i32 = arith.constant 0 : i32
    %14 = arith.cmpi eq, %arg1, %c0_i32 : i32
    %15 = arith.extui %14 : i1 to i32
    %c0_i32_7 = arith.constant 0 : i32
    %16 = arith.cmpi ne, %15, %c0_i32_7 : i32
    scf.if %16 {
      %c0_10 = arith.constant 0 : index
      %c0_11 = arith.constant 0 : index
      %c0_12 = arith.constant 0 : index
      %20 = vector.load %arg5[%c0_10, %c0_11, %c0_12] : memref<1x64x4xbf16, #tpu.memory_space<vmem>>, vector<1x64x4xbf16>
      %21 = vector.shape_cast %20 : vector<1x64x4xbf16> to vector<64x4xbf16>
      %22 = vector.shape_cast %11 : vector<64x4xbf16> to vector<1x64x4xbf16>
      tpu.vector_store %arg5[%c0_10, %c0_11, %c0_12], %22 {strides = array<i32>} : memref<1x64x4xbf16, #tpu.memory_space<vmem>>, vector<1x64x4xbf16>,
      %c0_13 = arith.constant 0 : index
      %c0_14 = arith.constant 0 : index
      %c0_15 = arith.constant 0 : index
      %23 = vector.load %arg6[%c0_13, %c0_14, %c0_15] : memref<1x64x16xbf16, #tpu.memory_space<vmem>>, vector<1x64x16xbf16>
      %24 = vector.shape_cast %23 : vector<1x64x16xbf16> to vector<64x16xbf16>
      %25 = vector.shape_cast %13 : vector<64x16xbf16> to vector<1x64x16xbf16>
      tpu.vector_store %arg6[%c0_13, %c0_14, %c0_15], %25 {strides = array<i32>} : memref<1x64x16xbf16, #tpu.memory_space<vmem>>, vector<1x64x16xbf16>,
    } else {
    }
    %c0_i32_8 = arith.constant 0 : i32
    %17 = arith.cmpi sgt, %arg1, %c0_i32_8 : i32
    %18 = arith.extui %17 : i1 to i32
    %c0_i32_9 = arith.constant 0 : i32
    %19 = arith.cmpi ne, %18, %c0_i32_9 : i32
    scf.if %19 {
      %c0_10 = arith.constant 0 : index
      %c0_11 = arith.constant 0 : index
      %c0_12 = arith.constant 0 : index
      %20 = vector.load %arg5[%c0_10, %c0_11, %c0_12] : memref<1x64x4xbf16, #tpu.memory_space<vmem>>, vector<1x64x4xbf16>
      %21 = vector.shape_cast %20 : vector<1x64x4xbf16> to vector<64x4xbf16>
      %22 = arith.maximumf %21, %11 : vector<64x4xbf16>
      %c0_13 = arith.constant 0 : index
      %c0_14 = arith.constant 0 : index
      %c0_15 = arith.constant 0 : index
      %23 = vector.load %arg5[%c0_13, %c0_14, %c0_15] : memref<1x64x4xbf16, #tpu.memory_space<vmem>>, vector<1x64x4xbf16>
      %24 = vector.shape_cast %23 : vector<1x64x4xbf16> to vector<64x4xbf16>
      %25 = vector.shape_cast %22 : vector<64x4xbf16> to vector<1x64x4xbf16>
      tpu.vector_store %arg5[%c0_13, %c0_14, %c0_15], %25 {strides = array<i32>} : memref<1x64x4xbf16, #tpu.memory_space<vmem>>, vector<1x64x4xbf16>,
      %c0_16 = arith.constant 0 : index
      %c0_17 = arith.constant 0 : index
      %c0_18 = arith.constant 0 : index
      %26 = vector.load %arg6[%c0_16, %c0_17, %c0_18] : memref<1x64x16xbf16, #tpu.memory_space<vmem>>, vector<1x64x16xbf16>
      %27 = vector.shape_cast %26 : vector<1x64x16xbf16> to vector<64x16xbf16>
      %28 = arith.maximumf %27, %13 : vector<64x16xbf16>
      %c0_19 = arith.constant 0 : index
      %c0_20 = arith.constant 0 : index
      %c0_21 = arith.constant 0 : index
      %29 = vector.load %arg6[%c0_19, %c0_20, %c0_21] : memref<1x64x16xbf16, #tpu.memory_space<vmem>>, vector<1x64x16xbf16>
      %30 = vector.shape_cast %29 : vector<1x64x16xbf16> to vector<64x16xbf16>
      %31 = vector.shape_cast %28 : vector<64x16xbf16> to vector<1x64x16xbf16>
      tpu.vector_store %arg6[%c0_19, %c0_20, %c0_21], %31 {strides = array<i32>} : memref<1x64x16xbf16, #tpu.memory_space<vmem>>, vector<1x64x16xbf16>,
    } else {
    }
    return
  }
  func.func @transform_0(%arg0: i32, %arg1: i32) -> (i32, i32, i32) {
    %c0_i32 = arith.constant 0 : i32
    %c0_i32_0 = arith.constant 0 : i32
    return %arg0, %arg1, %c0_i32 : i32, i32, i32
  }
  func.func @transform_1(%arg0: i32, %arg1: i32) -> (i32, i32) {
    %c0_i32 = arith.constant 0 : i32
    %c0_i32_0 = arith.constant 0 : i32
    %c0_i32_1 = arith.constant 0 : i32
    return %c0_i32, %c0_i32_0 : i32, i32
  }
  func.func @transform_2(%arg0: i32, %arg1: i32) -> (i32, i32, i32) {
    %c0_i32 = arith.constant 0 : i32
    %c0_i32_0 = arith.constant 0 : i32
    return %arg0, %arg1, %c0_i32 : i32, i32, i32
  }
  func.func @transform_3(%arg0: i32, %arg1: i32) -> (i32, i32, i32) {
    %c0_i32 = arith.constant 0 : i32
    %c0_i32_0 = arith.constant 0 : i32
    %c0_i32_1 = arith.constant 0 : i32
    return %arg0, %c0_i32, %c0_i32_0 : i32, i32, i32
  }
  func.func @transform_4(%arg0: i32, %arg1: i32) -> (i32, i32, i32) {
    %c0_i32 = arith.constant 0 : i32
    %c0_i32_0 = arith.constant 0 : i32
    %c0_i32_1 = arith.constant 0 : i32
    return %arg0, %c0_i32, %c0_i32_0 : i32, i32, i32
  }
}

</mosaic_0001>

<bundles_post_ra>
// kernel: tpu_custom_call.1
= control target key start
LH: loop header
LB: loop body
LE: loop exit
PB: predicated region body
PF: predicated region fallthrough
CT: control target
= control target key end

     0   :  { %s964_s15 = smov 0   ;;  %s966_s16 = smov 0   ;;  %s1151_s0 = inlined_call_operand.vmem [shape: f32[2,256,32], index: 0, kind: input, shape index: {}]   ;;  %s1152_s1 = inlined_call_operand.vmem [shape: bf16[32,24], index: 1, kind: input, shape index: {}]   ;;  %s1153_s2 = inlined_call_operand.vmem [shape: bf16[2,256,4], index: 2, kind: output, shape index: {0}]   ;;  %s1154_s3 = inlined_call_operand.vmem [shape: bf16[2,64,4], index: 3, kind: output, shape index: {1}]   ;;  %s1155_s4 = inlined_call_operand.vmem [shape: bf16[2,64,16], index: 4, kind: output, shape index: {2}]  }
   0x1   :  { %s968_s17 = smov 0   ;;  %s970_s18 = smov 0  }
   0x2   :  { %s972_s19 = smov 0  }
   0x3 LB: > { %s24_s20 = sadd.s32 1, %s925_s17  ;;  %s27_s21 = sadd.s32 1, %s929_s18  ;;  %s933_s19 = sphi %s972_s19, %s15_s19   ;;  %s929_s18 = sphi %s970_s18, %s1159_s18   ;;  %s925_s17 = sphi %s968_s17, %s1158_s17   ;;  %s921_s16 = sphi %s966_s16, %s1157_s16   ;;  %s917_s15 = sphi %s964_s15, %s1156_s15  }
   0x4   : > { %p25_p0 = scmp.ge.s32.totalorder %s24_s20, 4  ;;  %p736_p1 = scmp.ge.s32.totalorder %s933_s19, 1 }
   0x5   : > { %p188_p2 = scmp.lt.s32.totalorder %s933_s19, 9 }
   0x6   : > { %s1161_s20 = smov (%p25_p0, %s24_s20), 0  ;;  %s1163_s21 = smov (!%p25_p0, %s27_s21), %s929_s18 }
   0x7   : > { %p189_p3 = pnand %p736_p1, %p188_p2  ;;  %p29_p4 = scmp.ge.s32.totalorder %s1163_s21, 2 }
   0x8   : > { %s737_s24 = sshll.u32 (!%p189_p3), %s917_s15, 3  ;;  %p233_p5 = scmp.lt.s32.totalorder (!%p189_p3), %s921_s16, 1 }
   0x9   : > { %s1165_s21 = smov (%p29_p4, %s1163_s21), 0  ;;  %192 = sbr.rel (%p189_p3) target bundleno = 473 (0x1d9), region = 28 }
   0xa   : > { %p235_p6 = scmp.lt.s32.totalorder (!%p189_p3), %s737_s24, 31  ;;  %p759_p7 = scmp.ne.s32.totalorder (!%p189_p3), %s917_s15, 0 }
   0xe   : > { %v766_v0 = vld [vmem:[%s1152_s1 + $0x8] sm:$0xff]  ;;  %v765_v1 = vld [vmem:[%s1152_s1] sm:$0xff]  ;;  %s1167_s16 = smov (!%p233_p5, %s921_s16), 1  ;;  %s1169_s24 = smov (!%p235_p6, %s737_s24), 31  ;;  %vm291_vm0 = vcmask 261120   ;;  %vm341_vm1 = vcmask 27648  }
   0xf   : > { %310 = vmatpush.bf16.msra.mxu0 %v766_v0  ;;  %805 = vmatpush.bf16.msra.mxu1 %v766_v0  ;;  %s738_s27 = sshll.u32 %s1167_s16, 5  ;;  %s935_s23 = smov (!%p759_p7), 124  }
  0x10   : > { %806 = vmatpush.bf16.msra.mxu2 %v766_v0  ;;  %807 = vmatpush.bf16.msra.mxu3 %v766_v0  ;;  %s238_s28 = sadd.s32 %s738_s27, %s1169_s24  ;;  %s1006_s5 = scalar_lea.vmem %s1154_s3, %s738_s27 }
  0x11   : > { %s739_s6 = sshll.u32 %s238_s28, 3  ;;  %s1011_s9 = scalar_lea.vmem %s1155_s4, %s738_s27 }
  0x12   : > { %s240_s12 = scalar_lea.vmem %s1151_s0, %s739_s6  ;;  %s742_s13 = sshll.u32 %s238_s28, 2 }
  0x13   : > { %311 = vmatpush.bf16.msra.mxu0 %v765_v1  ;;  %808 = vmatpush.bf16.msra.mxu1 %v765_v1  ;;  %v263_v2 = vld [vmem:[%s240_s12] sm:$0xff]  ;;  %v264_v3 = vld [vmem:[%s240_s12 + $0x8] sm:$0xff]  ;;  %v265_v4 = vld [vmem:[%s240_s12 + $0x10] sm:$0xff]  ;;  %s250_s22 = scalar_lea.vmem %s1153_s2, %s742_s13  ;;  %s936_s24 = smov (!%p759_p7), 120  }
  0x14   : > { %809 = vmatpush.bf16.msra.mxu2 %v765_v1  ;;  %810 = vmatpush.bf16.msra.mxu3 %v765_v1  ;;  %v271_v5 = vpack.c.bf16 %v264_v3, %v263_v2  ;;  %v266_v6 = vld [vmem:[%s240_s12 + $0x18] sm:$0xff]  ;;  %v267_v7 = vld [vmem:[%s240_s12 + $0x20] sm:$0xff]  ;;  %v268_v8 = vld [vmem:[%s240_s12 + $0x28] sm:$0xff] }
  0x15   : > { %v272_v9 = vpack.c.bf16 %v266_v6, %v265_v4  ;;  %v273_v10 = vpack.c.bf16 %v268_v8, %v267_v7  ;;  %v269_v11 = vld [vmem:[%s240_s12 + $0x30] sm:$0xff]  ;;  %v270_v12 = vld [vmem:[%s240_s12 + $0x38] sm:$0xff] }
  0x16   : > { %755 = vmatmul.msk.bf16.vlgmr.msra.gmra.mxu0 %vm291_vm0, %v271_v5  ;;  %v274_v13 = vpack.c.bf16 %v270_v12, %v269_v11 }
  0x17   : > { %756 = vmatmul.msk.bf16.vlgmr.msra.gmra.mxu1 %vm291_vm0, %v272_v9  ;;  %757 = vmatmul.msk.bf16.vlgmr.msra.gmra.mxu2 %vm291_vm0, %v273_v10 }
  0x18   : > { %758 = vmatmul.msk.bf16.vlgmr.msra.gmra.mxu3 %vm291_vm0, %v274_v13 }
  0x93   : > { %v1019_v14 = vpop.f32.mrf.mxu0 }
  0x94   : > { %v333_v15 = vpack.c.bf16 %v1019_v14, %v1019_v14  ;;  %v1023_v16 = vpop.f32.mrf.mxu1 }
  0x95   : > { %v335_v17 = vpack.c.bf16 %v1023_v16, %v1023_v16 }
  0x96   : > { %342 = vst.msk [vmem:[%s250_s22] sm:$0xf] %vm341_vm1, %v333_v15 }
  0x97   : > { %344 = vst.msk [vmem:[%s250_s22 + $0x8] sm:$0xf] %vm341_vm1, %v335_v17 }
  0x9a   : > { %v1029_v18 = vpop.f32.mrf.mxu2 }
  0x9b   : > { %v337_v19 = vpack.c.bf16 %v1029_v18, %v1029_v18  ;;  %v1033_v20 = vpop.f32.mrf.mxu3  ;;  %v1035_v21 = vpop.f32.mrf.mxu0 }
  0x9c   : > { %v339_v22 = vpack.c.bf16 %v1033_v20, %v1033_v20  ;;  %v334_v23 = vpack.c.bf16 %v1035_v21, %v1035_v21  ;;  %v1041_v24 = vpop.f32.mrf.mxu1 }
  0x9d   : > { %346 = vst.msk [vmem:[%s250_s22 + $0x10] sm:$0xf] %vm341_vm1, %v337_v19  ;;  %v336_v25 = vpack.c.bf16 %v1041_v24, %v1041_v24 }
  0x9e   : > { %348 = vst.msk [vmem:[%s250_s22 + $0x18] sm:$0xf] %vm341_vm1, %v339_v22 }
  0x9f   : > { %343 = vst.msk [vmem:[%s250_s22 + $0x4] sm:$0xf] %vm341_vm1, %v334_v23 }
  0xa0   : > { %345 = vst.msk [vmem:[%s250_s22 + $0xc] sm:$0xf] %vm341_vm1, %v336_v25 }
  0xa2   : > { %v325_v26 = vpop.f32.mrf.mxu2  ;;  %353 = sbr.rel (%p759_p7) target bundleno = 323 (0x143), region = 32 }
  0xa3   : > { %v338_v27 = vpack.c.bf16 %v325_v26, %v325_v26  ;;  %v1049_v28 = vpop.f32.mrf.mxu3 }
  0xa4   : > { %v340_v29 = vpack.c.bf16 %v1049_v28, %v1049_v28 }
  0xa5   : > { %347 = vst.msk [vmem:[%s250_s22 + $0x14] sm:$0xf] %vm341_vm1, %v338_v27 }
  0xa6   : > { %349 = vst.msk [vmem:[%s250_s22 + $0x1c] sm:$0xf] %vm341_vm1, %v340_v29 }
  0xa7   : > { %362 = vrot.lane.b32.xlu0 %v333_v15, %s935_s23  ;;  %366 = vrot.lane.b32.xlu1 %v335_v17, %s935_s23  ;;  %vm418_vm2 = vcmask 125952  }
  0xa8   : > { %370 = vrot.lane.b32.xlu2 %v337_v19, %s935_s23 }
  0xaf   : > { %364 = vrot.lane.b32.xlu0 %v334_v23, %s935_s23  ;;  %368 = vrot.lane.b32.xlu1 %v336_v25, %s935_s23 }
  0xb0   : > { %372 = vrot.lane.b32.xlu2 %v338_v27, %s935_s23 }
  0xb7   : > { %374 = vrot.lane.b32.xlu0 %v339_v22, %s935_s23  ;;  %376 = vrot.lane.b32.xlu1 %v340_v29, %s935_s23 }
  0xb8   : > { %394 = vrot.lane.b32.xlu2 %v333_v15, %s936_s24 }
  0xbf   : > { %396 = vrot.lane.b32.xlu0 %v334_v23, %s936_s24  ;;  %398 = vrot.lane.b32.xlu1 %v335_v17, %s936_s24 }
  0xc0   : > { %400 = vrot.lane.b32.xlu2 %v336_v25, %s936_s24 }
  0xc7   : > { %402 = vrot.lane.b32.xlu0 %v337_v19, %s936_s24  ;;  %404 = vrot.lane.b32.xlu1 %v338_v27, %s936_s24 }
  0xc8   : > { %406 = vrot.lane.b32.xlu2 %v339_v22, %s936_s24 }
  0xcf   : > { %408 = vrot.lane.b32.xlu0 %v340_v29, %s936_s24 }
 0x102   : > { %v371_v30 = vpop.permute.xlu2 %370 }
 0x103   : > { %390 = vst.msk [vmem:[%s1006_s5 + $0x10] sm:$0xf] %vm341_vm1, %v371_v30 }
 0x10a   : > { %v373_v31 = vpop.permute.xlu2 %372 }
 0x10b   : > { %391 = vst.msk [vmem:[%s1006_s5 + $0x14] sm:$0xf] %vm341_vm1, %v373_v31 }
 0x112   : > { %v395_v32 = vpop.permute.xlu2 %394 }
 0x113   : > { %419 = vst.msk [vmem:[%s1011_s9] sm:$0xf] %vm418_vm2, %v395_v32 }
 0x119   : > { %v363_v33 = vpop.permute.xlu0 %362  ;;  %v367_v34 = vpop.permute.xlu1 %366 }
 0x11a   : > { %386 = vst.msk [vmem:[%s1006_s5] sm:$0xf] %vm341_vm1, %v363_v33  ;;  %v401_v35 = vpop.permute.xlu2 %400 }
 0x11b   : > { %388 = vst.msk [vmem:[%s1006_s5 + $0x8] sm:$0xf] %vm341_vm1, %v367_v34 }
 0x11c   : > { %422 = vst.msk [vmem:[%s1011_s9 + $0xc] sm:$0xf] %vm418_vm2, %v401_v35 }
 0x121   : > { %v365_v36 = vpop.permute.xlu0 %364  ;;  %v369_v37 = vpop.permute.xlu1 %368 }
 0x122   : > { %387 = vst.msk [vmem:[%s1006_s5 + $0x4] sm:$0xf] %vm341_vm1, %v365_v36  ;;  %v407_v38 = vpop.permute.xlu2 %406 }
 0x123   : > { %389 = vst.msk [vmem:[%s1006_s5 + $0xc] sm:$0xf] %vm341_vm1, %v369_v37 }
 0x124   : > { %425 = vst.msk [vmem:[%s1011_s9 + $0x18] sm:$0xf] %vm418_vm2, %v407_v38 }
 0x129   : > { %v375_v39 = vpop.permute.xlu0 %374  ;;  %v377_v40 = vpop.permute.xlu1 %376 }
 0x12a   : > { %392 = vst.msk [vmem:[%s1006_s5 + $0x18] sm:$0xf] %vm341_vm1, %v375_v39 }
 0x12b   : > { %393 = vst.msk [vmem:[%s1006_s5 + $0x1c] sm:$0xf] %vm341_vm1, %v377_v40 }
 0x131   : > { %v397_v41 = vpop.permute.xlu0 %396  ;;  %v399_v42 = vpop.permute.xlu1 %398 }
 0x132   : > { %420 = vst.msk [vmem:[%s1011_s9 + $0x4] sm:$0xf] %vm418_vm2, %v397_v41 }
 0x133   : > { %421 = vst.msk [vmem:[%s1011_s9 + $0x8] sm:$0xf] %vm418_vm2, %v399_v42 }
 0x139   : > { %v403_v43 = vpop.permute.xlu0 %402  ;;  %v405_v44 = vpop.permute.xlu1 %404 }
 0x13a   : > { %423 = vst.msk [vmem:[%s1011_s9 + $0x10] sm:$0xf] %vm418_vm2, %v403_v43 }
 0x13b   : > { %424 = vst.msk [vmem:[%s1011_s9 + $0x14] sm:$0xf] %vm418_vm2, %v405_v44 }
 0x141   : > { %v409_v45 = vpop.permute.xlu0 %408 }
 0x142   : > { %426 = vst.msk [vmem:[%s1011_s9 + $0x1c] sm:$0xf] %vm418_vm2, %v409_v45 }
 0x143 PF: > { %p760_p8 = scmp.le.s32.totalorder %s917_s15, 0 }
 0x144   : > { %s937_s25 = smov (!%p760_p8), 124   ;;  %s938_s26 = smov (!%p760_p8), 120  }
 0x145   : > { %430 = sbr.rel (%p760_p8) target bundleno = 473 (0x1d9), region = 36 }
 0x14a   : > { %v865_v46 = vpack.i.bf16 %v325_v26, %v1029_v18  ;;  %v855_v47 = vpack.i.bf16 %v1035_v21, %v1019_v14  ;;  %v870_v48 = vpack.i.bf16 %v1049_v28, %v1033_v20  ;;  %v860_v49 = vpack.i.bf16 %v1041_v24, %v1023_v16  ;;  %v784_v50 = vld [vmem:[%s1011_s9] sm:$0xff]   ;;  %v802_v60 = vld [vmem:[%s1011_s9 + $0x8] sm:$0xff]   ;;  %v800_v6 = vld [vmem:[%s1006_s5 + $0x10] sm:$0xff]  }
 0x14b   : > { %v785_v52 = vunpack.c.l.bf16 %v784_v50  ;;  %v786_v53 = vunpack.c.h.bf16 %v784_v50  ;;  %vm567_vm3 = vcmask 125952   ;;  %v789_v62 = vunpack.c.l.bf16 %v802_v60  ;;  %v768_v7 = vld [vmem:[%s1006_s5] sm:$0xff]   ;;  %v801_v22 = vld [vmem:[%s1006_s5 + $0x18] sm:$0xff]   ;;  %v799_v23 = vld [vmem:[%s1006_s5 + $0x8] sm:$0xff]  }
 0x14c   : > { %866 = vrot.lane.b32.xlu1 %v865_v46, %s937_s25  ;;  %856 = vrot.lane.b32.xlu0 %v855_v47, %s937_s25  ;;  %v790_v63 = vunpack.c.h.bf16 %v802_v60  ;;  %v777_v8 = vunpack.c.l.bf16 %v800_v6  ;;  %v778_v9 = vunpack.c.h.bf16 %v800_v6  ;;  %v769_v10 = vunpack.c.l.bf16 %v768_v7  ;;  %v804_v42 = vld [vmem:[%s1011_s9 + $0x18] sm:$0xff]   ;;  %v803_v43 = vld [vmem:[%s1011_s9 + $0x10] sm:$0xff]  }
 0x14d   : > { %876 = vrot.lane.b32.xlu2 %v855_v47, %s938_s26  ;;  %v770_v11 = vunpack.c.h.bf16 %v768_v7  ;;  %v781_v28 = vunpack.c.l.bf16 %v801_v22  ;;  %v782_v29 = vunpack.c.h.bf16 %v801_v22  ;;  %v773_v30 = vunpack.c.l.bf16 %v799_v23 }
 0x14e   : > { %v774_v31 = vunpack.c.h.bf16 %v799_v23  ;;  %v793_v50 = vunpack.c.l.bf16 %v803_v43 }
 0x154   : > { %871 = vrot.lane.b32.xlu1 %v870_v48, %s937_s25  ;;  %861 = vrot.lane.b32.xlu0 %v860_v49, %s937_s25 }
 0x155   : > { %881 = vrot.lane.b32.xlu2 %v860_v49, %s938_s26  ;;  %v798_v49 = vunpack.c.h.bf16 %v804_v42 }
 0x15c   : > { %891 = vrot.lane.b32.xlu1 %v870_v48, %s938_s26  ;;  %886 = vrot.lane.b32.xlu0 %v865_v46, %s938_s26  ;;  %v797_v48 = vunpack.c.l.bf16 %v804_v42 }
 0x1a7   : > { %v877_v51 = vpop.permute.xlu2 %876 }
 0x1a8   : > { %v879_v54 = vunpack.i.h.bf16 %v877_v51  ;;  %v878_v55 = vunpack.i.l.bf16 %v877_v51  ;;  %v794_v51 = vunpack.c.h.bf16 %v803_v43 }
 0x1aa   : > { %v552_v56 = vmax.f32 %v786_v53, %v879_v54  ;;  %v551_v57 = vmax.f32 %v785_v52, %v878_v55 }
 0x1ac   : > { %v560_v58 = vpack.c.bf16 %v552_v56, %v552_v56  ;;  %v559_v59 = vpack.c.bf16 %v551_v57, %v551_v57 }
 0x1ae   : > { %569 = vst.msk [vmem:[%s1011_s9 + $0x4] sm:$0xf] %vm567_vm3, %v560_v58 }
 0x1af   : > { %568 = vst.msk [vmem:[%s1011_s9] sm:$0xf] %vm567_vm3, %v559_v59  ;;  %v882_v61 = vpop.permute.xlu2 %881 }
 0x1b0   : > { %v884_v0 = vunpack.i.h.bf16 %v882_v61  ;;  %v883_v1 = vunpack.i.l.bf16 %v882_v61 }
 0x1b2   : > { %v554_v2 = vmax.f32 %v790_v63, %v884_v0  ;;  %v553_v3 = vmax.f32 %v789_v62, %v883_v1 }
 0x1b4   : > { %v562_v4 = vpack.c.bf16 %v554_v2, %v554_v2  ;;  %v561_v5 = vpack.c.bf16 %v553_v3, %v553_v3 }
 0x1b6   : > { %571 = vst.msk [vmem:[%s1011_s9 + $0xc] sm:$0xf] %vm567_vm3, %v562_v4 }
 0x1b7   : > { %570 = vst.msk [vmem:[%s1011_s9 + $0x8] sm:$0xf] %vm567_vm3, %v561_v5 }
 0x1be   : > { %v867_v12 = vpop.permute.xlu1 %866  ;;  %v857_v13 = vpop.permute.xlu0 %856 }
 0x1bf   : > { %v869_v14 = vunpack.i.h.bf16 %v867_v12  ;;  %v868_v15 = vunpack.i.l.bf16 %v867_v12  ;;  %v859_v16 = vunpack.i.h.bf16 %v857_v13  ;;  %v858_v17 = vunpack.i.l.bf16 %v857_v13 }
 0x1c1   : > { %v491_v18 = vmax.f32 %v777_v8, %v868_v15  ;;  %v492_v19 = vmax.f32 %v778_v9, %v869_v14  ;;  %v487_v20 = vmax.f32 %v769_v10, %v858_v17  ;;  %v488_v21 = vmax.f32 %v770_v11, %v859_v16 }
 0x1c3   : > { %v499_v24 = vpack.c.bf16 %v491_v18, %v491_v18  ;;  %v500_v25 = vpack.c.bf16 %v492_v19, %v492_v19  ;;  %v495_v26 = vpack.c.bf16 %v487_v20, %v487_v20  ;;  %v496_v27 = vpack.c.bf16 %v488_v21, %v488_v21 }
 0x1c5   : > { %507 = vst.msk [vmem:[%s1006_s5 + $0x10] sm:$0xf] %vm341_vm1, %v499_v24 }
 0x1c6   : > { %508 = vst.msk [vmem:[%s1006_s5 + $0x14] sm:$0xf] %vm341_vm1, %v500_v25  ;;  %v872_v32 = vpop.permute.xlu1 %871  ;;  %v862_v33 = vpop.permute.xlu0 %861 }
 0x1c7   : > { %503 = vst.msk [vmem:[%s1006_s5] sm:$0xf] %vm341_vm1, %v495_v26  ;;  %v874_v34 = vunpack.i.h.bf16 %v872_v32  ;;  %v873_v35 = vunpack.i.l.bf16 %v872_v32  ;;  %v864_v36 = vunpack.i.h.bf16 %v862_v33  ;;  %v863_v37 = vunpack.i.l.bf16 %v862_v33 }
 0x1c8   : > { %504 = vst.msk [vmem:[%s1006_s5 + $0x4] sm:$0xf] %vm341_vm1, %v496_v27 }
 0x1c9   : > { %v493_v38 = vmax.f32 %v781_v28, %v873_v35  ;;  %v494_v39 = vmax.f32 %v782_v29, %v874_v34  ;;  %v489_v40 = vmax.f32 %v773_v30, %v863_v37  ;;  %v490_v41 = vmax.f32 %v774_v31, %v864_v36 }
 0x1cb   : > { %v501_v44 = vpack.c.bf16 %v493_v38, %v493_v38  ;;  %v502_v45 = vpack.c.bf16 %v494_v39, %v494_v39  ;;  %v497_v46 = vpack.c.bf16 %v489_v40, %v489_v40  ;;  %v498_v47 = vpack.c.bf16 %v490_v41, %v490_v41 }
 0x1cd   : > { %509 = vst.msk [vmem:[%s1006_s5 + $0x18] sm:$0xf] %vm341_vm1, %v501_v44 }
 0x1ce   : > { %510 = vst.msk [vmem:[%s1006_s5 + $0x1c] sm:$0xf] %vm341_vm1, %v502_v45  ;;  %v892_v52 = vpop.permute.xlu1 %891  ;;  %v887_v53 = vpop.permute.xlu0 %886 }
 0x1cf   : > { %505 = vst.msk [vmem:[%s1006_s5 + $0x8] sm:$0xf] %vm341_vm1, %v497_v46  ;;  %v894_v54 = vunpack.i.h.bf16 %v892_v52  ;;  %v893_v55 = vunpack.i.l.bf16 %v892_v52  ;;  %v889_v56 = vunpack.i.h.bf16 %v887_v53  ;;  %v888_v57 = vunpack.i.l.bf16 %v887_v53 }
 0x1d0   : > { %506 = vst.msk [vmem:[%s1006_s5 + $0xc] sm:$0xf] %vm341_vm1, %v498_v47 }
 0x1d1   : > { %v558_v58 = vmax.f32 %v798_v49, %v894_v54  ;;  %v557_v59 = vmax.f32 %v797_v48, %v893_v55  ;;  %v556_v60 = vmax.f32 %v794_v51, %v889_v56  ;;  %v555_v61 = vmax.f32 %v793_v50, %v888_v57 }
 0x1d3   : > { %v566_v62 = vpack.c.bf16 %v558_v58, %v558_v58  ;;  %v565_v63 = vpack.c.bf16 %v557_v59, %v557_v59  ;;  %v564_v0 = vpack.c.bf16 %v556_v60, %v556_v60  ;;  %v563_v1 = vpack.c.bf16 %v555_v61, %v555_v61 }
 0x1d5   : > { %575 = vst.msk [vmem:[%s1011_s9 + $0x1c] sm:$0xf] %vm567_vm3, %v566_v62 }
 0x1d6   : > { %574 = vst.msk [vmem:[%s1011_s9 + $0x18] sm:$0xf] %vm567_vm3, %v565_v63 }
 0x1d7   : > { %573 = vst.msk [vmem:[%s1011_s9 + $0x14] sm:$0xf] %vm567_vm3, %v564_v0 }
 0x1d8   : > { %572 = vst.msk [vmem:[%s1011_s9 + $0x10] sm:$0xf] %vm567_vm3, %v563_v1 }
 0x1d9 PF: > { %s15_s19 = sadd.s32 1, %s933_s19   ;;  %s1156_s15 = smov %s925_s17 }
 0x1da   : > { %p12_p9 = scmp.ge.s32.totalorder %s15_s19, 10   ;;  %s1157_s16 = smov %s929_s18 }
 0x1db   : > { %s1158_s17 = smov %s1161_s20  ;;  %s1159_s18 = smov %s1165_s21 }
 0x1dc   :  { %14 = sbr.rel (!%p12_p9) target bundleno = 3 (0x3), region = 90 }

</bundles_post_ra>
